<compile_context>
chip_gen: v7x
topology: tpu7x:2x2x1
jax: 0.10.0
libtpu: 0.0.40
codegen_flags: <defaults>
</compile_context>

<pallas_src>
import math
import numpy as np
import jax
import jax.numpy as jnp
from jax.experimental import pallas as pl
from jax.experimental.pallas import tpu as pltpu

# ---------------- module hyperparameters (deterministic, in-script) ----------------
N = 3            # nodes per segment (polynomial order n-1)
SEGMENTS = 4     # number of segments
IN_CHANNELS = 4
OUT_CHANNELS = 4
KERNEL_SIZE = 3
LENGTH = 2.0     # interpolation range [-1, 1]
HALF = LENGTH * 0.5
RESCALE = 1.0    # rescale_output=False

NS = N * SEGMENTS                                # basis size per input channel (12)
C_EXP = IN_CHANNELS * NS                         # expanded channel count (48)
K_RAW = KERNEL_SIZE * KERNEL_SIZE * IN_CHANNELS  # raw im2col lanes (36)
K_P = ((K_RAW + 7) // 8) * 8                     # sublane-aligned raw lanes (40)
K_E = NS * K_P                                   # folded contraction length (480)
OC_P = 8                                         # out channels padded to one sublane tile
TM_MAX = 1024                                    # max rows (lanes) per grid step
TM_MIN = 128

INV_SEG_WIDTH = float(SEGMENTS / LENGTH)         # exactly 2.0 here (no runtime divide)
SEG_WIDTH = float(LENGTH / SEGMENTS)


def chebyshev_lobatto(n):
    k = np.arange(n)
    pts = -np.cos(k * math.pi / (n - 1))
    pts = np.where(np.abs(pts) < 1e-15, 0.0, pts)
    return pts.astype(np.float32)


NODES = ((LENGTH / 2.0) * chebyshev_lobatto(N)).astype(np.float32)
# Baked reciprocal Lagrange denominators: prod_{m != j} 1/(x_j - x_m)
LAG_SCALE = np.array(
    [np.prod([1.0 / (NODES[j] - NODES[m]) for m in range(N) if m != j])
     for j in range(N)],
    dtype=np.float32,
)


# ------------------------------- Pallas kernel -------------------------------------
def expand_conv_kernel(p_ref, w_ref, o_ref, e_ref):
    # p_ref: [K_P, TM] raw patch scalars (K on sublanes, output-pixels on lanes)
    # w_ref: [OC_P, K_E] folded weights (resident)
    # o_ref: [OC_P, TM] lane-dense output tile
    # e_ref: [K_E, TM]  VMEM scratch holding the folded discontinuous expansion
    x = p_ref[...]

    # segment index (floor + clamp), divide-free; matches the torch reference exactly
    # for power-of-two LENGTH/SEGMENTS ratios (true here).
    idx = jnp.clip(jnp.floor((x + HALF) * INV_SEG_WIDTH), 0.0, SEGMENTS - 1.0)
    x_min = idx * SEG_WIDTH - HALF
    x_loc = SEGMENTS * (x - x_min) - HALF            # local coord in [-HALF, HALF]

    # Lagrange basis L_j(x_loc) with baked reciprocal denominators (no divides)
    basis = []
    for j in range(N):
        bj = None
        for m in range(N):
            if m != j:
                term = x_loc - float(NODES[m])
                bj = term if bj is None else bj * term
        if bj is None:                               # N == 1 degenerate case
            bj = jnp.ones_like(x)
        basis.append(bj * float(LAG_SCALE[j]))

    # Discontinuous piecewise expansion, written as 12 sublane-aligned 40-row blocks
    # of a single folded E[K_E, TM]; padded rows/cols are killed by zero weight rows.
    for s in range(SEGMENTS):
        in_seg = idx == float(s)
        for j in range(N):
            w = s * N + j
            e_ref[w * K_P:(w + 1) * K_P, :] = jnp.where(in_seg, basis[j], 0.0)

    # One MXU-accumulated contraction: [OC_P, K_E] @ [K_E, TM] -> lane-dense [OC_P, TM]
    o_ref[...] = jnp.dot(w_ref[...], e_ref[...], preferred_element_type=jnp.float32)


# ------------------------------- wrapper (glue) -------------------------------------
def _pick_tm(m, tm_max=TM_MAX, tm_min=TM_MIN):
    # Prefer big tiles (amortize per-step overhead), but keep >= 2 grid steps when
    # possible so ("parallel",) can shard the grid across v7x's two TensorCores.
    tm = tm_max
    while tm > tm_min and pl.cdiv(m, tm) < 2:
        tm //= 2
    return tm


def piecewise_disc_poly_conv2d(x_nchw, weight_oihw):
    """x_nchw: [B, C, H, W] f32; weight: [OC, C*n*segments, kh, kw] f32."""
    B, C, H, W = x_nchw.shape
    OC = weight_oihw.shape[0]
    OH = H - KERNEL_SIZE + 1
    OW = W - KERNEL_SIZE + 1
    M = B * OH * OW

    tm = _pick_tm(M)
    m_pad = pl.cdiv(M, tm) * tm                      # full tiles -> unmasked stores

    # raw im2col in K-major layout [K_P, m_pad] (no basis replication, no 128-lane pad)
    # sublane k = (dy*kw + dx)*C + c ; lane m = b*OH*OW + oh*OW + ow
    x_nhwc = jnp.transpose(x_nchw, (0, 2, 3, 1))     # [B, H, W, C]
    patches = []
    for dy in range(KERNEL_SIZE):
        for dx in range(KERNEL_SIZE):
            patches.append(x_nhwc[:, dy:dy + OH, dx:dx + OW, :])
    Pt = jnp.stack(patches, axis=0)                  # [kh*kw, B, OH, OW, C]
    Pt = jnp.transpose(Pt, (0, 4, 1, 2, 3)).reshape(K_RAW, M)
    Pt = jnp.pad(Pt, ((0, K_P - K_RAW), (0, m_pad - M)))

    # folded weight slab: Wm[oc, w*K_P + (tap*C + c)] = weight[oc, c*NS + w, dy, dx]
    Wr = weight_oihw.reshape(OC, C, NS, KERNEL_SIZE, KERNEL_SIZE)
    Wm = jnp.transpose(Wr, (0, 2, 3, 4, 1)).reshape(OC, NS, K_RAW)
    Wm = jnp.pad(Wm, ((0, OC_P - OC), (0, 0), (0, K_P - K_RAW)))
    Wm = (Wm * RESCALE).reshape(OC_P, K_E)           # rescale folded into weights

    out = pl.pallas_call(
        expand_conv_kernel,
        out_shape=jax.ShapeDtypeStruct((OC_P, m_pad), jnp.float32),
        grid=(m_pad // tm,),
        in_specs=[
            pl.BlockSpec((K_P, tm), lambda i: (0, i)),     # pipelined patch tiles
            pl.BlockSpec((OC_P, K_E), lambda i: (0, 0)),   # weights resident (~15 KiB)
        ],
        out_specs=pl.BlockSpec((OC_P, tm), lambda i: (0, i)),  # lane-dense output
        scratch_shapes=[pltpu.VMEM((K_E, tm), jnp.float32)],   # folded expansion E
        compiler_params=pltpu.CompilerParams(
            dimension_semantics=("parallel",)),
    )(Pt, Wm)

    # NOTE: padded output columns (m >= M) hold garbage from x=0 pad rows; they are
    # sliced off here -- do not alias/reuse the padded buffer without masking.
    out = out[:OC, :M].reshape(OC, B, OH, OW)
    return jnp.transpose(out, (1, 0, 2, 3))          # back to NCHW


# ------------------------------- plain-JAX reference --------------------------------
def reference(x_nchw, weight_oihw):
    B, C, H, W = x_nchw.shape
    half = LENGTH * 0.5
    idx = jnp.clip(jnp.floor((x_nchw + half) / LENGTH * SEGMENTS), 0.0, SEGMENTS - 1.0)
    x_min = idx * (LENGTH / SEGMENTS) - half
    xl = SEGMENTS * (x_nchw - x_min) - half
    basis = []
    for j in range(N):
        lj = jnp.ones_like(x_nchw)
        for m in range(N):
            if m != j:
                lj = lj * (xl - NODES[m]) / (NODES[j] - NODES[m])
        basis.append(lj)
    mats = [jnp.where(idx == (w // N), basis[w % N], 0.0) for w in range(NS)]
    mat = jnp.stack(mats, 0)                              # [NS, B, C, H, W]
    res = jnp.transpose(mat, (1, 3, 4, 2, 0)).reshape(B, H, W, C * NS)
    res = jnp.transpose(res, (0, 3, 1, 2))                # [B, C*NS, H, W]
    out = jax.lax.conv_general_dilated(
        res, weight_oihw, window_strides=(1, 1), padding="VALID",
        dimension_numbers=("NCHW", "OIHW", "NCHW"))
    return out * RESCALE


if __name__ == "__main__":
    key = jax.random.PRNGKey(0)
    kx, kw = jax.random.split(key)

    # input in the interpolation range [-1, 1]
    x = jax.random.uniform(kx, (2, IN_CHANNELS, 16, 16), jnp.float32, -1.0, 1.0)

    # conv2d_wrapper init: uniform(-1/in_features, 1/in_features), bias=False
    in_features = C_EXP * KERNEL_SIZE * KERNEL_SIZE
    weight = jax.random.uniform(
        kw, (OUT_CHANNELS, C_EXP, KERNEL_SIZE, KERNEL_SIZE), jnp.float32,
        -1.0 / in_features, 1.0 / in_features)

    out = piecewise_disc_poly_conv2d(x, weight)
    out = jax.block_until_ready(out)
    ref = jax.block_until_ready(reference(x, weight))

    assert out.shape == (2, OUT_CHANNELS, 14, 14), out.shape
    np.testing.assert_allclose(np.asarray(out), np.asarray(ref), rtol=1e-2, atol=1e-4)
    print("KERNEL_OK")
</pallas_src>

<mosaic_0001>
module attributes {stable_mosaic.version = 11 : i64} {
  func.func @expand_conv_kernel(%arg0: i32, %arg1: memref<40x256xf32, #tpu.memory_space<vmem>>, %arg2: memref<8x480xf32, #tpu.memory_space<vmem>>, %arg3: memref<8x256xf32, #tpu.memory_space<vmem>>, %arg4: memref<480x256xf32, #tpu.memory_space<vmem>>) attributes {dimension_semantics = [#tpu.dimension_semantics<parallel>], iteration_bounds = array<i64: 2>, scalar_prefetch = 0 : i64, scratch_operands = 1 : i64, tpu.core_type = #tpu.core_type<tc>, window_params = [{transform_indices = @transform_0, window_bounds = array<i64: 40, 256>}, {pipeline_mode = #tpu.pipeline_mode<synchronous>, transform_indices = @transform_1, window_bounds = array<i64: 8, 480>}, {transform_indices = @transform_2, window_bounds = array<i64: 8, 256>}]} {
    %c0 = arith.constant 0 : index
    %c0_0 = arith.constant 0 : index
    %0 = vector.load %arg1[%c0, %c0_0] : memref<40x256xf32, #tpu.memory_space<vmem>>, vector<40x256xf32>
    %cst = arith.constant 1.000000e+00 : f32
    %1 = vector.broadcast %cst : f32 to vector<40x256xf32>
    %2 = arith.addf %0, %1 : vector<40x256xf32>
    %cst_1 = arith.constant 2.000000e+00 : f32
    %3 = vector.broadcast %cst_1 : f32 to vector<40x256xf32>
    %4 = arith.mulf %2, %3 : vector<40x256xf32>
    %5 = math.floor %4 : vector<40x256xf32>
    %cst_2 = arith.constant 0.000000e+00 : f32
    %cst_3 = arith.constant 3.000000e+00 : f32
    %6 = vector.broadcast %cst_2 : f32 to vector<40x256xf32>
    %7 = arith.maximumf %6, %5 : vector<40x256xf32>
    %8 = vector.broadcast %cst_3 : f32 to vector<40x256xf32>
    %9 = arith.minimumf %8, %7 : vector<40x256xf32>
    %cst_4 = arith.constant 5.000000e-01 : f32
    %10 = vector.broadcast %cst_4 : f32 to vector<40x256xf32>
    %11 = arith.mulf %9, %10 : vector<40x256xf32>
    %cst_5 = arith.constant 1.000000e+00 : f32
    %12 = vector.broadcast %cst_5 : f32 to vector<40x256xf32>
    %13 = arith.subf %11, %12 : vector<40x256xf32>
    %14 = arith.subf %0, %13 : vector<40x256xf32>
    %cst_6 = arith.constant 4.000000e+00 : f32
    %15 = vector.broadcast %cst_6 : f32 to vector<40x256xf32>
    %16 = arith.mulf %15, %14 : vector<40x256xf32>
    %cst_7 = arith.constant 1.000000e+00 : f32
    %17 = vector.broadcast %cst_7 : f32 to vector<40x256xf32>
    %18 = arith.subf %16, %17 : vector<40x256xf32>
    %cst_8 = arith.constant 0.000000e+00 : f32
    %19 = vector.broadcast %cst_8 : f32 to vector<40x256xf32>
    %20 = arith.subf %18, %19 : vector<40x256xf32>
    %cst_9 = arith.constant 1.000000e+00 : f32
    %21 = vector.broadcast %cst_9 : f32 to vector<40x256xf32>
    %22 = arith.subf %18, %21 : vector<40x256xf32>
    %23 = arith.mulf %20, %22 : vector<40x256xf32>
    %cst_10 = arith.constant 5.000000e-01 : f32
    %24 = vector.broadcast %cst_10 : f32 to vector<40x256xf32>
    %25 = arith.mulf %23, %24 : vector<40x256xf32>
    %cst_11 = arith.constant -1.000000e+00 : f32
    %26 = vector.broadcast %cst_11 : f32 to vector<40x256xf32>
    %27 = arith.subf %18, %26 : vector<40x256xf32>
    %cst_12 = arith.constant 1.000000e+00 : f32
    %28 = vector.broadcast %cst_12 : f32 to vector<40x256xf32>
    %29 = arith.subf %18, %28 : vector<40x256xf32>
    %30 = arith.mulf %27, %29 : vector<40x256xf32>
    %cst_13 = arith.constant -1.000000e+00 : f32
    %31 = vector.broadcast %cst_13 : f32 to vector<40x256xf32>
    %32 = arith.mulf %30, %31 : vector<40x256xf32>
    %cst_14 = arith.constant -1.000000e+00 : f32
    %33 = vector.broadcast %cst_14 : f32 to vector<40x256xf32>
    %34 = arith.subf %18, %33 : vector<40x256xf32>
    %cst_15 = arith.constant 0.000000e+00 : f32
    %35 = vector.broadcast %cst_15 : f32 to vector<40x256xf32>
    %36 = arith.subf %18, %35 : vector<40x256xf32>
    %37 = arith.mulf %34, %36 : vector<40x256xf32>
    %cst_16 = arith.constant 5.000000e-01 : f32
    %38 = vector.broadcast %cst_16 : f32 to vector<40x256xf32>
    %39 = arith.mulf %37, %38 : vector<40x256xf32>
    %cst_17 = arith.constant 0.000000e+00 : f32
    %40 = vector.broadcast %cst_17 : f32 to vector<40x256xf32>
    %41 = arith.cmpf oeq, %9, %40 : vector<40x256xf32>
    %cst_18 = arith.constant 0.000000e+00 : f32
    %42 = vector.broadcast %cst_18 : f32 to vector<40x256xf32>
    %43 = arith.select %41, %25, %42 : vector<40x256xi1>, vector<40x256xf32>
    %c0_19 = arith.constant 0 : index
    %c0_20 = arith.constant 0 : index
    %44 = vector.load %arg4[%c0_19, %c0_20] : memref<480x256xf32, #tpu.memory_space<vmem>>, vector<40x256xf32>
    tpu.vector_store %arg4[%c0_19, %c0_20], %43 {strides = array<i32>} : memref<480x256xf32, #tpu.memory_space<vmem>>, vector<40x256xf32>,
    %cst_21 = arith.constant 0.000000e+00 : f32
    %45 = vector.broadcast %cst_21 : f32 to vector<40x256xf32>
    %46 = arith.select %41, %32, %45 : vector<40x256xi1>, vector<40x256xf32>
    %c40 = arith.constant 40 : index
    %c0_22 = arith.constant 0 : index
    %47 = vector.load %arg4[%c40, %c0_22] : memref<480x256xf32, #tpu.memory_space<vmem>>, vector<40x256xf32>
    tpu.vector_store %arg4[%c40, %c0_22], %46 {strides = array<i32>} : memref<480x256xf32, #tpu.memory_space<vmem>>, vector<40x256xf32>,
    %cst_23 = arith.constant 0.000000e+00 : f32
    %48 = vector.broadcast %cst_23 : f32 to vector<40x256xf32>
    %49 = arith.select %41, %39, %48 : vector<40x256xi1>, vector<40x256xf32>
    %c80 = arith.constant 80 : index
    %c0_24 = arith.constant 0 : index
    %50 = vector.load %arg4[%c80, %c0_24] : memref<480x256xf32, #tpu.memory_space<vmem>>, vector<40x256xf32>
    tpu.vector_store %arg4[%c80, %c0_24], %49 {strides = array<i32>} : memref<480x256xf32, #tpu.memory_space<vmem>>, vector<40x256xf32>,
    %cst_25 = arith.constant 1.000000e+00 : f32
    %51 = vector.broadcast %cst_25 : f32 to vector<40x256xf32>
    %52 = arith.cmpf oeq, %9, %51 : vector<40x256xf32>
    %cst_26 = arith.constant 0.000000e+00 : f32
    %53 = vector.broadcast %cst_26 : f32 to vector<40x256xf32>
    %54 = arith.select %52, %25, %53 : vector<40x256xi1>, vector<40x256xf32>
    %c120 = arith.constant 120 : index
    %c0_27 = arith.constant 0 : index
    %55 = vector.load %arg4[%c120, %c0_27] : memref<480x256xf32, #tpu.memory_space<vmem>>, vector<40x256xf32>
    tpu.vector_store %arg4[%c120, %c0_27], %54 {strides = array<i32>} : memref<480x256xf32, #tpu.memory_space<vmem>>, vector<40x256xf32>,
    %cst_28 = arith.constant 0.000000e+00 : f32
    %56 = vector.broadcast %cst_28 : f32 to vector<40x256xf32>
    %57 = arith.select %52, %32, %56 : vector<40x256xi1>, vector<40x256xf32>
    %c160 = arith.constant 160 : index
    %c0_29 = arith.constant 0 : index
    %58 = vector.load %arg4[%c160, %c0_29] : memref<480x256xf32, #tpu.memory_space<vmem>>, vector<40x256xf32>
    tpu.vector_store %arg4[%c160, %c0_29], %57 {strides = array<i32>} : memref<480x256xf32, #tpu.memory_space<vmem>>, vector<40x256xf32>,
    %cst_30 = arith.constant 0.000000e+00 : f32
    %59 = vector.broadcast %cst_30 : f32 to vector<40x256xf32>
    %60 = arith.select %52, %39, %59 : vector<40x256xi1>, vector<40x256xf32>
    %c200 = arith.constant 200 : index
    %c0_31 = arith.constant 0 : index
    %61 = vector.load %arg4[%c200, %c0_31] : memref<480x256xf32, #tpu.memory_space<vmem>>, vector<40x256xf32>
    tpu.vector_store %arg4[%c200, %c0_31], %60 {strides = array<i32>} : memref<480x256xf32, #tpu.memory_space<vmem>>, vector<40x256xf32>,
    %cst_32 = arith.constant 2.000000e+00 : f32
    %62 = vector.broadcast %cst_32 : f32 to vector<40x256xf32>
    %63 = arith.cmpf oeq, %9, %62 : vector<40x256xf32>
    %cst_33 = arith.constant 0.000000e+00 : f32
    %64 = vector.broadcast %cst_33 : f32 to vector<40x256xf32>
    %65 = arith.select %63, %25, %64 : vector<40x256xi1>, vector<40x256xf32>
    %c240 = arith.constant 240 : index
    %c0_34 = arith.constant 0 : index
    %66 = vector.load %arg4[%c240, %c0_34] : memref<480x256xf32, #tpu.memory_space<vmem>>, vector<40x256xf32>
    tpu.vector_store %arg4[%c240, %c0_34], %65 {strides = array<i32>} : memref<480x256xf32, #tpu.memory_space<vmem>>, vector<40x256xf32>,
    %cst_35 = arith.constant 0.000000e+00 : f32
    %67 = vector.broadcast %cst_35 : f32 to vector<40x256xf32>
    %68 = arith.select %63, %32, %67 : vector<40x256xi1>, vector<40x256xf32>
    %c280 = arith.constant 280 : index
    %c0_36 = arith.constant 0 : index
    %69 = vector.load %arg4[%c280, %c0_36] : memref<480x256xf32, #tpu.memory_space<vmem>>, vector<40x256xf32>
    tpu.vector_store %arg4[%c280, %c0_36], %68 {strides = array<i32>} : memref<480x256xf32, #tpu.memory_space<vmem>>, vector<40x256xf32>,
    %cst_37 = arith.constant 0.000000e+00 : f32
    %70 = vector.broadcast %cst_37 : f32 to vector<40x256xf32>
    %71 = arith.select %63, %39, %70 : vector<40x256xi1>, vector<40x256xf32>
    %c320 = arith.constant 320 : index
    %c0_38 = arith.constant 0 : index
    %72 = vector.load %arg4[%c320, %c0_38] : memref<480x256xf32, #tpu.memory_space<vmem>>, vector<40x256xf32>
    tpu.vector_store %arg4[%c320, %c0_38], %71 {strides = array<i32>} : memref<480x256xf32, #tpu.memory_space<vmem>>, vector<40x256xf32>,
    %cst_39 = arith.constant 3.000000e+00 : f32
    %73 = vector.broadcast %cst_39 : f32 to vector<40x256xf32>
    %74 = arith.cmpf oeq, %9, %73 : vector<40x256xf32>
    %cst_40 = arith.constant 0.000000e+00 : f32
    %75 = vector.broadcast %cst_40 : f32 to vector<40x256xf32>
    %76 = arith.select %74, %25, %75 : vector<40x256xi1>, vector<40x256xf32>
    %c360 = arith.constant 360 : index
    %c0_41 = arith.constant 0 : index
    %77 = vector.load %arg4[%c360, %c0_41] : memref<480x256xf32, #tpu.memory_space<vmem>>, vector<40x256xf32>
    tpu.vector_store %arg4[%c360, %c0_41], %76 {strides = array<i32>} : memref<480x256xf32, #tpu.memory_space<vmem>>, vector<40x256xf32>,
    %cst_42 = arith.constant 0.000000e+00 : f32
    %78 = vector.broadcast %cst_42 : f32 to vector<40x256xf32>
    %79 = arith.select %74, %32, %78 : vector<40x256xi1>, vector<40x256xf32>
    %c400 = arith.constant 400 : index
    %c0_43 = arith.constant 0 : index
    %80 = vector.load %arg4[%c400, %c0_43] : memref<480x256xf32, #tpu.memory_space<vmem>>, vector<40x256xf32>
    tpu.vector_store %arg4[%c400, %c0_43], %79 {strides = array<i32>} : memref<480x256xf32, #tpu.memory_space<vmem>>, vector<40x256xf32>,
    %cst_44 = arith.constant 0.000000e+00 : f32
    %81 = vector.broadcast %cst_44 : f32 to vector<40x256xf32>
    %82 = arith.select %74, %39, %81 : vector<40x256xi1>, vector<40x256xf32>
    %c440 = arith.constant 440 : index
    %c0_45 = arith.constant 0 : index
    %83 = vector.load %arg4[%c440, %c0_45] : memref<480x256xf32, #tpu.memory_space<vmem>>, vector<40x256xf32>
    tpu.vector_store %arg4[%c440, %c0_45], %82 {strides = array<i32>} : memref<480x256xf32, #tpu.memory_space<vmem>>, vector<40x256xf32>,
    %c0_46 = arith.constant 0 : index
    %c0_47 = arith.constant 0 : index
    %84 = vector.load %arg2[%c0_46, %c0_47] : memref<8x480xf32, #tpu.memory_space<vmem>>, vector<8x480xf32>
    %c0_48 = arith.constant 0 : index
    %c0_49 = arith.constant 0 : index
    %85 = vector.load %arg4[%c0_48, %c0_49] : memref<480x256xf32, #tpu.memory_space<vmem>>, vector<480x256xf32>
    %cst_50 = arith.constant dense<0.000000e+00> : vector<8x256xf32>
    %86 = tpu.matmul %84, %85, %cst_50 {dimension_numbers = #tpu.dot_dimension_numbers<[1], [0], [0], [1], [0, 0, 1, 1], [], []>} : vector<8x480xf32>, vector<480x256xf32>, vector<8x256xf32> -> vector<8x256xf32>
    %c0_51 = arith.constant 0 : index
    %c0_52 = arith.constant 0 : index
    %87 = vector.load %arg3[%c0_51, %c0_52] : memref<8x256xf32, #tpu.memory_space<vmem>>, vector<8x256xf32>
    tpu.vector_store %arg3[%c0_51, %c0_52], %86 {strides = array<i32>} : memref<8x256xf32, #tpu.memory_space<vmem>>, vector<8x256xf32>,
    return
  }
  func.func @transform_0(%arg0: i32) -> (i32, i32) {
    %c0_i32 = arith.constant 0 : i32
    %c0_i32_0 = arith.constant 0 : i32
    return %c0_i32, %arg0 : i32, i32
  }
  func.func @transform_1(%arg0: i32) -> (i32, i32) {
    %c0_i32 = arith.constant 0 : i32
    %c0_i32_0 = arith.constant 0 : i32
    %c0_i32_1 = arith.constant 0 : i32
    return %c0_i32, %c0_i32_0 : i32, i32
  }
  func.func @transform_2(%arg0: i32) -> (i32, i32) {
    %c0_i32 = arith.constant 0 : i32
    %c0_i32_0 = arith.constant 0 : i32
    return %c0_i32, %arg0 : i32, i32
  }
}

</mosaic_0001>

<bundles_post_ra>
// kernel: tpu_custom_call.1
= control target key start
LH: loop header
LB: loop body
LE: loop exit
PB: predicated region body
PF: predicated region fallthrough
CT: control target
= control target key end

     0   :  { %7 = vsyncpa [#allocation4], 0  ;;  %s2526_s0 = inlined_call_operand.hbm [shape: f32[40,512], index: 0, kind: input, shape index: {}]   ;;  %s2527_s1 = inlined_call_operand.hbm [shape: f32[8,480], index: 1, kind: input, shape index: {}]   ;;  %s2528_s2 = inlined_call_operand.hbm [shape: f32[8,512], index: 2, kind: output, shape index: {}]  }
   0x1   :  { %9 = vsyncpa [#allocation4 + $0x1], 0 }
   0x2   :  { %10 = vsyncpa [#allocation7], 0 }
   0x3   :  { %11 = vsyncpa [#allocation5], 0 }
   0x4   :  { %13 = vsyncpa [#allocation5 + $0x1], 0  ;;  %s1586_s9 = smov 0   ;;  %s1588_s10 = smov 0  }
   0x5   :  { %s1590_s11 = smov 0   ;;  %s1592_s12 = smov 0  }
   0x6 LB: > { %s1607_s13 = sadd.s32 4294967295, %s1563_s12   ;;  %s1014_s14 = sadd.s32 4294967294, %s1563_s12   ;;  %s1563_s12 = sphi %s1592_s12, %s2723_s12   ;;  %s1559_s11 = sphi %s1590_s11, %s2722_s11   ;;  %s1555_s10 = sphi %s1588_s10, %s2721_s10   ;;  %s1551_s9 = sphi %s1586_s9, %s2720_s9  }
   0x7   : > { %s1611_s15 = sadd.s32 1, %s1563_s12   ;;  %s26_s16 = sadd.s32 1, %s1559_s11 }
   0x8   : > { %s23_s17 = ssub.s32 %s1563_s12, %s1611_s15  ;;  %p33_p0 = scmp.ne.s32.totalorder %s1559_s11, %s1555_s10 }
   0x9   : > { %p24_p1 = scmp.eq.s32.totalorder %s23_s17, 0  ;;  %p34_p2 = scmp.eq.s32.totalorder %s1563_s12, 0 }
   0xa   : > { %p39_p3 = scmp.ne.s32.totalorder %s1555_s10, %s1551_s9  ;;  %p2529_p4 = scmp.eq.s32.totalorder %s1607_s13, 0 }
   0xb   : > { %s1623_s18 = scalar_select %p24_p1, %s1559_s11, %s26_s16  }
   0xc   : > { %p1625_p5 = por %p34_p2, %p33_p0  ;;  %p1631_p6 = por %p2529_p4, %p39_p3 }
   0xd   : > { %p84_p7 = scmp.eq.s32.totalorder %s1607_s13, 1  ;;  %p90_p8 = scmp.eq.s32.totalorder %s1014_s14, 1 }
   0xe   : > { %s2583_s20 = scalar_select %p1631_p6, 1, 0 }
   0xf   : > { %p1015_p9 = scmp.ge.s32.totalorder %s1563_s12, 1  ;;  %p97_p10 = scmp.lt.s32.totalorder %s1563_s12, 3 }
  0x10   : > { %p1638_p11 = por %p84_p7, %p33_p0  ;;  %p1642_p12 = por %p90_p8, %p39_p3 }
  0x11   : > { %p1646_p13 = pnand %p1015_p9, %p97_p10  ;;  %s1565_s24 = smov [#allocation6]  }
  0x12   : > { %s2584_s21 = scalar_select %p1638_p11, 1, 0 }
  0x13   : > { %s2585_s22 = scalar_select %p1642_p12, 1, 0 }
  0x14   : > { %s2586_s23 = scalar_select %p1646_p13, 1, 0 }
  0x15   : > { %p1383_p2 = pneg %p1646_p13  ;;  %s110_s25 = sshll.u32 %s1565_s24, 4  ;;  %s111_s25 = int_to_ptr.vmem [resolvable:$true] %s110_s25 }
  0x16   : > { %p1396_p4 = scmp.lt.s32.totalorder %s1563_s12, 2  ;;  %p2587_p0 = scmp.eq.s32.totalorder %s1607_s13, 0 }
  0x17   : > { %s121_s27 = sand.u32 1, %s1559_s11   ;;  %s1435_s4 = scalar_lea.hbm %s2527_s1, 512 }
  0x18   : > { %p1656_p7 = pnand %p1383_p2, %p2587_p0  ;;  %p1663_p3 = pnand %p1396_p4, %p1625_p5 }
  0x19   : > { %s1373_s29 = smul.u32 80, %s121_s27  ;;  %p1436_p8 = scmp.ne.s32.totalorder %s2527_s1, %s1435_s4 }
  0x1a   : > { %s2589_s28 = scalar_select %p1663_p3, 1, 0 }
  0x1b   : > { %p1437_p9 = pneg %p1656_p7  ;;  %p1442_p4 = scmp.lt.u32.totalorder %s1435_s4, %s2527_s1 }
  0x1d   : > { %p1438_p10 = pnand %p1437_p9, %p1436_p8 }
  0x1f   : > { %p1439_p2 = pneg %p1438_p10 }
  0x21   : > { %p1444_p5 = pnand %p1442_p4, %p1439_p2 }
  0x23   : > { %1447 = shalt.err (!%p1444_p5)
}
  0x24   : > { %s1448_s14 = scalar_lea.vmem %s111_s25, 512  ;;  %p1456_p11 = scmp.lt.s32.totalorder %s111_s25, %s111_s25 }
  0x25   : > { %p1449_p0 = scmp.ne.s32.totalorder %s111_s25, %s1448_s14  ;;  %p1457_p6 = scmp.lt.s32.totalorder %s1448_s14, %s1448_s14 }
  0x27   : > { %p1451_p1 = pnand %p1449_p0, %p1437_p9  ;;  %p1458_p13 = por %p1457_p6, %p1456_p11 }
  0x29   : > { %p1452_p12 = pneg %p1451_p1 }
  0x2b   : > { %p1459_p3 = pnand %p1458_p13, %p1452_p12 }
  0x2d   : > { %1462 = shalt.err (!%p1459_p3)
}
  0x2e   : > { %1386 = dma.hbm_to_vmem [thread:$0]  (!%p1656_p7), %s2527_s1, 512, %s111_s25, [#allocation7]  }
  0x2f   : > { %s1069_s19 = sshll.u32 %s1563_s12, 8  ;;  %s125_s24 = scalar_lea.vmem [#allocation3], %s1373_s29 }
  0x30   : > { %s132_s30 = sshll.u32 %s125_s24, 4  ;;  %s1687_s5 = scalar_lea.hbm %s2526_s0, %s1069_s19  ;;  %s1689_s30 = int_to_ptr.vmem [resolvable:$true] %s132_s30 }
  0x31   : > { %s1691_s26 = scalar_lea.sflag [#allocation4], %s121_s27  ;;  %s1463_s6 = scalar_lea.hbm %s1687_s5, 1280 }
  0x32   : > { %p1464_p6 = scmp.ne.s32.totalorder %s1687_s5, %s1463_s6  ;;  %p2590_p11 = scmp.ne.s32.totalorder %s2589_s28, 0 }
  0x33   : > { %s1468_s7 = scalar_lea.hbm %s2526_s0, 2560  ;;  %p1469_p7 = scmp.lt.u32.totalorder %s1687_s5, %s2526_s0 }
  0x34   : > { %p1465_p12 = pneg %p2590_p11  ;;  %p1470_p3 = scmp.lt.u32.totalorder %s1468_s7, %s1463_s6 }
  0x35   : > { %p1472_p9 = scmp.lt.u32.totalorder %s1463_s6, %s1687_s5 }
  0x36   : > { %p1466_p13 = pnand %p1465_p12, %p1464_p6  ;;  %p1471_p8 = por %p1470_p3, %p1469_p7 }
  0x38   : > { %p1467_p1 = pneg %p1466_p13  ;;  %p1473_p10 = por %p1472_p9, %p1471_p8 }
  0x3a   : > { %p1474_p2 = pnand %p1473_p10, %p1467_p1 }
  0x3c   : > { %1477 = shalt.err (!%p1474_p2)
}
  0x3d   : > { %s1478_s27 = scalar_lea.vmem %s1689_s30, 1280  ;;  %s1566_s16 = smov [#allocation3]  }
  0x3e   : > { %p1479_p4 = scmp.ne.s32.totalorder %s1689_s30, %s1478_s27  ;;  %s1483_s17 = sshll.u32 %s1566_s16, 4  ;;  %s1484_s17 = int_to_ptr.vmem [resolvable:$false] %s1483_s17 }
  0x3f   : > { %s1485_s19 = scalar_lea.vmem %s1484_s17, 2560  ;;  %p1486_p6 = scmp.lt.s32.totalorder %s1689_s30, %s1484_s17 }
  0x40   : > { %p1481_p5 = pnand %p1479_p4, %p1465_p12  ;;  %p1487_p13 = scmp.lt.s32.totalorder %s1485_s19, %s1478_s27 }
  0x42   : > { %p1482_p0 = pneg %p1481_p5  ;;  %p1488_p7 = por %p1487_p13, %p1486_p6 }
  0x44   : > { %p1489_p3 = pnand %p1488_p7, %p1482_p0 }
  0x46   : > { %1492 = shalt.err (!%p1489_p3)
}
  0x47   : > { %s1567_s24 = smov 512   ;;  %s1568_s3 = smov 256  }
  0x48   : > { %s1569_s4 = smov 16   ;;  %p2591_p12 = scmp.ne.s32.totalorder %s2586_s23, 0 }
  0x49   : > { %1390 = dma.hbm_to_vmem [thread:$0]  (!%p2590_p11), %s1687_s5, 1280, %s1689_s30, %s1691_s26, %s1567_s24, %s1568_s3, %s1569_s4  }
  0x4a   : > { %144 = sbr.rel (%p2591_p12) target bundleno = 429 (0x1ad), region = 28 }
  0x51   : > { %s1722_s6 = sand.u32 1, %s1555_s10   ;;  %p2592_p1 = scmp.ne.s32.totalorder %s2583_s20, 0 }
  0x52   : > { %s1374_s25 = smul.u32 80, %s1722_s6  ;;  %s147_s29 = scalar_lea.sflag [#allocation4], %s1722_s6 }
  0x54   : > { %s1726_s7 = scalar_lea.vmem [#allocation3], %s1374_s25 }
  0x55   : > { %1538 = dma.done.wait (%p2592_p1), %s147_s29, 1280  }
  0x56   : > { %1540 = vsyncadd (%p2592_p1), %s147_s29, 4294966016  ;;  %p2593_p11 = scmp.eq.s32.totalorder %s1607_s13, 0 }
  0x58   : > { %1542 = dma.done.wait (%p2593_p11), [#allocation7], 512   ;;  %p2594_p8 = pmov %p2593_p11 }
  0x59   : > { %v1737_v0 = vld [vmem:[%s1726_s7 + $0x8] sm:$0xff]  ;;  %v1740_v1 = vld [vmem:[%s1726_s7 + $0x18] sm:$0xff]  ;;  %vm771_vm0 = vcmask 785408   ;;  %v1752_v7 = vld [vmem:[%s1726_s7] sm:$0xff]  ;;  %s1022_s20 = sshll.u32 %s1722_s6, 4  ;;  %s1070_s23 = sshll.u32 %s1607_s13, 8 }
  0x5a   : > { %1544 = vsyncadd (%p2594_p8), [#allocation7], 4294966784  ;;  %v1743_v2 = vld [vmem:[%s1726_s7 + $0x28] sm:$0xff]  ;;  %v188_v4 = vadd.f32 1.0, %v1737_v0  ;;  %v190_v5 = vadd.f32 1.0, %v1740_v1  ;;  %v1755_v8 = vld [vmem:[%s1726_s7 + $0x10] sm:$0xff]  ;;  %s2482_s8 = scalar_lea.hbm %s2528_s2, %s1070_s23 }
  0x5b   : > { %v1746_v3 = vld [vmem:[%s1726_s7 + $0x48] sm:$0xff]  ;;  %v192_v6 = vadd.f32 1.0, %v1743_v2  ;;  %v187_v10 = vadd.f32 1.0, %v1752_v7  ;;  %v189_v11 = vadd.f32 1.0, %v1755_v8  ;;  %v1761_v12 = vld [vmem:[%s1726_s7 + $0x38] sm:$0xff]  ;;  %v1781_v45 = vld [vmem:[%s1726_s7 + $0x20] sm:$0xff] }
  0x5c   : > { %v196_v9 = vadd.f32 1.0, %v1746_v3  ;;  %v198_v13 = vmul.f32 2.0, %v188_v4  ;;  %v200_v14 = vmul.f32 2.0, %v190_v5  ;;  %v194_v16 = vadd.f32 1.0, %v1761_v12  ;;  %v650_v17 = vld [vmem:[#allocation6 + $0x18] sm:$0xff]  ;;  %v648_v21 = vld [vmem:[#allocation6 + $0x8] sm:$0xff] }
  0x5d   : > { %v202_v15 = vmul.f32 2.0, %v192_v6  ;;  %v197_v19 = vmul.f32 2.0, %v187_v10  ;;  %v199_v20 = vmul.f32 2.0, %v189_v11  ;;  %1063 = vmatprep.mubr.msk.f32.mxu0 %vm771_vm0, %v650_v17  ;;  %839 = vmatprep.mubr.f32.mxu1 %v648_v21  ;;  %v1785_v51 = vld [vmem:[%s1726_s7 + $0x30] sm:$0xff]  ;;  %v191_v54 = vadd.f32 1.0, %v1781_v45  ;;  %s174_s28 = scalar_lea.vmem [#allocation8], %s1022_s20 }
  0x5e   : > { %v206_v18 = vmul.f32 2.0, %v196_v9  ;;  %v208_v22 = vfloor.f32 %v198_v13  ;;  %v210_v23 = vfloor.f32 %v200_v14  ;;  %v204_v25 = vmul.f32 2.0, %v194_v16  ;;  %s934_s30 = sshll.u32 %s174_s28, 4  ;;  %s920_s14 = scalar_lea.sflag [#allocation5], %s1722_s6  ;;  %s2484_s30 = int_to_ptr.vmem [resolvable:$true] %s934_s30 }
  0x5f   : > { %v212_v24 = vfloor.f32 %v202_v15  ;;  %v207_v27 = vfloor.f32 %v197_v19  ;;  %v209_v28 = vfloor.f32 %v199_v20  ;;  %v193_v61 = vadd.f32 1.0, %v1785_v51  ;;  %s1493_s13 = scalar_lea.vmem %s2484_s30, 256  ;;  %p2717_p10 = scmp.ne.s32.totalorder %s2584_s21, 0 }
  0x60   : > { %v216_v26 = vfloor.f32 %v206_v18  ;;  %v218_v29 = vmax.f32 %v208_v22, 0.0  ;;  %v220_v30 = vmax.f32 %v210_v23, 0.0  ;;  %v214_v35 = vfloor.f32 %v204_v25  ;;  %p1494_p9 = scmp.ne.s32.totalorder %s2484_s30, %s1493_s13  ;;  %s1570_s27 = smov [#allocation8]  }
  0x61   : > { %v222_v31 = vmax.f32 %v212_v24, 0.0  ;;  %v217_v33 = vmax.f32 %v207_v27, 0.0  ;;  %v219_v34 = vmax.f32 %v209_v28, 0.0  ;;  %v201_v10 = vmul.f32 2.0, %v191_v54  ;;  %s1497_s16 = sshll.u32 %s1570_s27, 4  ;;  %s1498_s16 = int_to_ptr.vmem [resolvable:$false] %s1497_s16 }
  0x62   : > { %v226_v32 = vmax.f32 %v216_v26, 0.0  ;;  %v1765_v36 = vmin.f32 %v218_v29, 3.0  ;;  %v1767_v37 = vmin.f32 %v220_v30, 3.0  ;;  %v224_v46 = vmax.f32 %v214_v35, 0.0  ;;  %p1495_p2 = pnand %p1494_p9, %p2717_p10  ;;  %s1499_s17 = scalar_lea.vmem %s1498_s16, 512 }
  0x63   : > { %v1769_v38 = vmin.f32 %v222_v31, 3.0  ;;  %v1773_v40 = vmin.f32 %v217_v33, 3.0  ;;  %v1775_v41 = vmin.f32 %v219_v34, 3.0  ;;  %v203_v14 = vmul.f32 2.0, %v193_v61  ;;  %p1500_p5 = scmp.lt.s32.totalorder %s2484_s30, %s1498_s16  ;;  %p1501_p0 = scmp.lt.s32.totalorder %s1499_s17, %s1493_s13 }
  0x64   : > { %v1771_v39 = vmin.f32 %v226_v32, 3.0  ;;  %v238_v42 = vmul.f32 0.5, %v1765_v36  ;;  %v240_v43 = vmul.f32 0.5, %v1767_v37  ;;  %v1793_v60 = vmin.f32 %v224_v46, 3.0  ;;  %p1496_p4 = pneg %p1495_p2 }
  0x65   : > { %v242_v44 = vmul.f32 0.5, %v1769_v38  ;;  %v237_v50 = vmul.f32 0.5, %v1773_v40  ;;  %v239_v53 = vmul.f32 0.5, %v1775_v41  ;;  %vm368_vm1 = vcmp.eq.f32.partialorder %v1765_v36, 0.0  ;;  %p1502_p6 = por %p1501_p0, %p1500_p5 }
  0x66   : > { %v1024_v47 = vadd.f32 -1.0, %v238_v42  ;;  %v1026_v48 = vadd.f32 -1.0, %v240_v43  ;;  %v246_v52 = vmul.f32 0.5, %v1771_v39  ;;  %v244_v11 = vmul.f32 0.5, %v1793_v60 }
  0x67   : > { %v1028_v49 = vadd.f32 -1.0, %v242_v44  ;;  %v1023_v58 = vadd.f32 -1.0, %v237_v50  ;;  %v1025_v59 = vadd.f32 -1.0, %v239_v53  ;;  %vm370_vm2 = vcmp.eq.f32.partialorder %v1767_v37, 0.0  ;;  %v1877_v50 = vld [vmem:[%s1726_s7 + $0x40] sm:$0xff]  ;;  %p1503_p13 = pnand %p1502_p6, %p1496_p4 }
  0x68   : > { %v258_v55 = vsub.f32 %v1737_v0, %v1024_v47  ;;  %v260_v56 = vsub.f32 %v1740_v1, %v1026_v48  ;;  %v1032_v5 = vadd.f32 -1.0, %v246_v52  ;;  %v1030_v21 = vadd.f32 -1.0, %v244_v11  ;;  %vm1837_vm4 = vmpackc.low %vm370_vm2, %vm368_vm1 }
  0x69   : > { %v262_v57 = vsub.f32 %v1743_v2, %v1028_v49  ;;  %v257_v4 = vsub.f32 %v1752_v7, %v1023_v58  ;;  %v259_v9 = vsub.f32 %v1755_v8, %v1025_v59  ;;  %v211_v22 = vfloor.f32 %v201_v10 }
  0x6a   : > { %v268_v62 = vmul.f32 4.0, %v258_v55  ;;  %v270_v63 = vmul.f32 4.0, %v260_v56  ;;  %v266_v7 = vsub.f32 %v1746_v3, %v1032_v5  ;;  %v213_v3 = vfloor.f32 %v203_v14 }
  0x6b   : > { %v272_v6 = vmul.f32 4.0, %v262_v57  ;;  %v267_v2 = vmul.f32 4.0, %v257_v4  ;;  %v269_v13 = vmul.f32 4.0, %v259_v9  ;;  %vm2536_vm3 = vcmp.eq.f32.partialorder %v1773_v40, 0.0 }
  0x6c   : > { %v1798_v0 = vadd.f32 -1.0, %v268_v62  ;;  %v1800_v1 = vadd.f32 -1.0, %v270_v63  ;;  %vm2534_vm5 = vcmp.eq.f32.partialorder %v1775_v41, 0.0  ;;  %v276_v31 = vmul.f32 4.0, %v266_v7 }
  0x6d   : > { %v1810_v8 = vadd.f32 -1.0, %v272_v6  ;;  %v1812_v17 = vadd.f32 -1.0, %v267_v2  ;;  %v1814_v18 = vadd.f32 -1.0, %v269_v13  ;;  %v264_v33 = vsub.f32 %v1761_v12, %v1030_v21  ;;  %vm1862_vm6 = vmpackc.low %vm2534_vm5, %vm2536_vm3 }
  0x6e   : > { %v1044_v15 = vadd.f32 -1.0, %v1798_v0  ;;  %v1805_v16 = vadd.f32 -1.0, %v1800_v1  ;;  %v221_v34 = vmax.f32 %v211_v22, 0.0  ;;  %v223_v43 = vmax.f32 %v213_v3, 0.0 }
  0x6f   : > { %v1820_v23 = vadd.f32 -1.0, %v1812_v17  ;;  %v1823_v24 = vadd.f32 -1.0, %v1814_v18  ;;  %v1831_v27 = vadd.f32 -1.0, %v1810_v8  ;;  %v274_v46 = vmul.f32 4.0, %v264_v33 }
  0x70   : > { %v298_v19 = vmul.f32 %v1044_v15, %v1798_v0  ;;  %v300_v20 = vmul.f32 %v1805_v16, %v1800_v1  ;;  %v1866_v12 = vmin.f32 %v221_v34, 3.0  ;;  %v1874_v49 = vmin.f32 %v223_v43, 3.0 }
  0x71   : > { %v297_v29 = vmul.f32 %v1820_v23, %v1812_v17  ;;  %v299_v30 = vmul.f32 %v1823_v24, %v1814_v18  ;;  %v302_v47 = vmul.f32 %v1831_v27, %v1810_v8  ;;  %v1879_v52 = vadd.f32 -1.0, %v276_v31 }
  0x72   : > { %v1825_v25 = vmul.f32 0.5, %v298_v19  ;;  %v1827_v26 = vmul.f32 0.5, %v300_v20  ;;  %v1881_v53 = vadd.f32 -1.0, %v274_v46  ;;  %v241_v54 = vmul.f32 0.5, %v1866_v12 }
  0x73   : > { %v1851_v35 = vmul.f32 0.5, %v297_v29  ;;  %v1853_v42 = vmul.f32 0.5, %v299_v30  ;;  %vm372_vm7 = vcmp.eq.f32.partialorder %v1769_v38, 0.0  ;;  %vm2538_vm8 = vcmp.eq.f32.partialorder %v1793_v60, 0.0 }
  0x74   : > { %v1848_v32 = vpack.c.bf16 %v1827_v26, %v1825_v25  ;;  %v243_v55 = vmul.f32 0.5, %v1874_v49  ;;  %v1891_v56 = vadd.f32 1.0, %v1798_v0  ;;  %v1894_v57 = vadd.f32 -1.0, %v1881_v53  ;;  %vm1912_vm11 = vmpackc.low %vm2538_vm8, %vm372_vm7 }
  0x75   : > { %v1872_v48 = vpack.c.bf16 %v1853_v42, %v1851_v35  ;;  %v1027_v58 = vadd.f32 -1.0, %v241_v54  ;;  %v195_v59 = vadd.f32 1.0, %v1877_v50  ;;  %v1897_v61 = vmul.f32 0.5, %v302_v47 }
  0x76   : > { %2597 = vst [vmem:[#allocation12_spill] sm:$0xff] %v1848_v32  ;;  %1193 = vmatprep.subr.msk.bf16.mxu1 %vm1837_vm4, %v1848_v32  ;;  %v1029_v62 = vadd.f32 -1.0, %v243_v55  ;;  %vm2537_vm9 = vcmp.eq.f32.partialorder %v1769_v38, 2.0  ;;  %vm2535_vm10 = vcmp.eq.f32.partialorder %v1793_v60, 2.0  ;;  %v304_v63 = vmul.f32 %v1894_v57, %v1881_v53 }
  0x77   : > { %2600 = vst [vmem:[#allocation13_spill] sm:$0xff] %v1872_v48  ;;  %1196 = vmatpush1.bf16.msk.msra.mxu1 %vm1862_vm6, %v1872_v48  ;;  %v261_v4 = vsub.f32 %v1781_v45, %v1027_v58  ;;  %v1052_v5 = vadd.f32 -1.0, %v1879_v52  ;;  %v205_v6 = vmul.f32 2.0, %v195_v59  ;;  %v328_v14 = vmul.f32 %v1891_v56, %v1044_v15  ;;  %vm1921_vm12 = vmpackc.low %vm2535_vm10, %vm2537_vm9 }
  0x78   : > { %v263_v9 = vsub.f32 %v1785_v51, %v1029_v62  ;;  %v1906_v10 = vmul.f32 0.5, %v304_v63  ;;  %v2603_v51 = vmov 0  ;;  %vm2547_vm13 = vcmp.eq.f32.partialorder %v1771_v39, 0.0 }
  0x79   : > { %v271_v11 = vmul.f32 4.0, %v261_v4  ;;  %v215_v13 = vfloor.f32 %v205_v6  ;;  %v2604_v51 = vsel %vm1921_vm12, 4294967295, %v2603_v51  ;;  %v306_v20 = vmul.f32 %v1052_v5, %v1879_v52  ;;  %vm1959_vm10 = vmpackc.low %vm368_vm1, %vm2547_vm13 }
  0x7a   : > { %v273_v45 = vmul.f32 4.0, %v263_v9  ;;  %v1197_v7 = vpack.c.bf16 %v1906_v10, %v1897_v61  ;;  %v1939_v29 = vmul.f32 -1.0, %v328_v14  ;;  %vm2543_vm14 = vcmp.eq.f32.partialorder %v1866_v12, 0.0 }
  0x7b   : > { %v1927_v19 = vadd.f32 -1.0, %v271_v11  ;;  %v225_v21 = vmax.f32 %v215_v13, 0.0  ;;  %vm2541_vm15 = vcmp.eq.f32.partialorder %v1874_v49, 0.0  ;;  %v1948_v33 = vmul.f32 0.5, %v306_v20 }
  0x7c   : > { %v1930_v22 = vadd.f32 -1.0, %v273_v45  ;;  %1199 = vmatprep.subr.msk.bf16.mxu1 %vm1912_vm11, %v1197_v7  ;;  %1289 = vmatprep.subr.msk.bf16.mxu0 %vm1921_vm12, %v1197_v7  ;;  %2605 = vst [vmem:[#allocation14_spill] sm:$0xff] %v1939_v29  ;;  %vm2542_vm0 = vcmp.eq.f32.partialorder %v1866_v12, 2.0  ;;  %vm2539_vm5 = vcmp.eq.f32.partialorder %v1874_v49, 2.0  ;;  %vm2544_vm3 = vcmp.eq.f32.partialorder %v1771_v39, 2.0  ;;  %vm1974_vm8 = vmpackc.low %vm2541_vm15, %vm2543_vm14 }
  0x7d   : > { %v1047_v15 = vadd.f32 -1.0, %v1927_v19  ;;  %v1937_v3 = vmin.f32 %v225_v21, 3.0  ;;  %vm2540_vm9 = vcmp.eq.f32.partialorder %v1765_v36, 2.0  ;;  %v1056_v55 = vadd.f32 1.0, %v1800_v1  ;;  %vm1987_vm1 = vmpackc.low %vm2539_vm5, %vm2542_vm0 }
  0x7e   : > { %v1943_v30 = vadd.f32 -1.0, %v1930_v22  ;;  %v2609_v59 = vmov 0  ;;  %v1979_v62 = vadd.f32 1.0, %v1810_v8  ;;  %v1203_v63 = vpack.c.bf16 %v1939_v29, %v1948_v33  ;;  %vm1294_vm5 = vmpackc.low %vm2540_vm9, %vm2544_vm3 }
  0x7f   : > { %v301_v31 = vmul.f32 %v1047_v15, %v1927_v19  ;;  %v245_v34 = vmul.f32 0.5, %v1937_v3  ;;  %v2610_v59 = vsel %vm1974_vm8, 4294967295, %v2609_v59  ;;  %v2611_v4 = vmov 0 }
  0x80   : > { %v303_v43 = vmul.f32 %v1943_v30, %v1930_v22  ;;  %v2612_v4 = vsel %vm1987_vm1, 4294967295, %v2611_v4  ;;  %v1053_v9 = vadd.f32 1.0, %v1812_v17  ;;  %v1055_v11 = vadd.f32 1.0, %v1814_v18 }
  0x81   : > { %v1963_v47 = vmul.f32 0.5, %v301_v31  ;;  %v1031_v54 = vadd.f32 -1.0, %v245_v34  ;;  %v1995_v13 = vadd.f32 1.0, %v1879_v52  ;;  %v1060_v45 = vadd.f32 1.0, %v1881_v53 }
  0x82   : > { %v1968_v58 = vmul.f32 0.5, %v303_v43  ;;  %v330_v20 = vmul.f32 %v1056_v55, %v1805_v16  ;;  %v332_v21 = vmul.f32 %v1979_v62, %v1831_v27  ;;  %v327_v34 = vmul.f32 %v1053_v9, %v1820_v23 }
  0x83   : > { %v265_v6 = vsub.f32 %v1877_v50, %v1031_v54  ;;  %v2005_v50 = vadd.f32 1.0, %v1927_v19  ;;  %v329_v43 = vmul.f32 %v1055_v11, %v1823_v24  ;;  %vm2550_vm9 = vcmp.eq.f32.partialorder %v1767_v37, 2.0 }
  0x84   : > { %2608 = vst [vmem:[#allocation15_spill] sm:$0xff] %v1968_v58  ;;  %v1200_v14 = vpack.c.bf16 %v1968_v58, %v1963_v47  ;;  %v334_v16 = vmul.f32 %v1060_v45, %v1894_v57  ;;  %v336_v54 = vmul.f32 %v1995_v13, %v1052_v5  ;;  %v1059_v46 = vadd.f32 1.0, %v1930_v22 }
  0x85   : > { %v275_v7 = vmul.f32 4.0, %v265_v6  ;;  %v331_v27 = vmul.f32 %v2005_v50, %v1047_v15  ;;  %v2040_v24 = vmul.f32 -1.0, %v332_v21  ;;  %vm2555_vm15 = vcmp.eq.f32.partialorder %v1773_v40, 2.0 }
  0x86   : > { %1202 = vmatpush1.bf16.msk.msra.mxu1 %vm1974_vm8, %v1200_v14  ;;  %1292 = vmatpush1.bf16.msk.msra.mxu0 %vm1987_vm1, %v1200_v14  ;;  %v2044_v5 = vmul.f32 -1.0, %v327_v34  ;;  %vm2558_vm0 = vcmp.eq.f32.partialorder %v1937_v3, 2.0  ;;  %v2047_v15 = vmul.f32 -1.0, %v329_v43  ;;  %vm2615_vm14 = vcmp.eq.f32.partialorder %v1793_v60, 0.0 }
  0x87   : > { %1205 = vmatprep.subr.msk.bf16.mxu1 %vm1959_vm10, %v1203_v63  ;;  %v2016_v31 = vadd.f32 -1.0, %v275_v7  ;;  %1295 = vmatprep.subr.msk.bf16.mxu0 %vm1294_vm5, %v1203_v63  ;;  %v2029_v7 = vmul.f32 -1.0, %v330_v20  ;;  %vm2035_vm5 = vmpackc.low %vm372_vm7, %vm370_vm2  ;;  %vm2552_vm10 = vcmp.eq.f32.partialorder %v1937_v3, 0.0  ;;  %vm2618_vm7 = vcmp.eq.f32.partialorder %v1769_v38, 2.0 }
  0x88   : > { %vm2053_vm2 = vmpackc.low %vm2547_vm13, %vm2615_vm14  ;;  %v2065_v21 = vmul.f32 -1.0, %v334_v16  ;;  %v2067_v34 = vmul.f32 -1.0, %v336_v54  ;;  %v348_v43 = vmul.f32 %v1891_v56, %v1798_v0  ;;  %v350_v48 = vmul.f32 %v1056_v55, %v1800_v1 }
  0x89   : > { %v1051_v6 = vadd.f32 -1.0, %v2016_v31  ;;  %v2027_v14 = vadd.f32 1.0, %v2016_v31  ;;  %vm2061_vm3 = vmpackc.low %vm2618_vm7, %vm2550_vm9  ;;  %vm2622_vm14 = vcmp.eq.f32.partialorder %v1773_v40, 0.0  ;;  %v2078_v29 = vmul.f32 -1.0, %v331_v27 }
  0x8a   : > { %2621 = vst [vmem:[#allocation16_spill] sm:$0xff] %v2067_v34  ;;  %vm1207_vm13 = vmpackc.low %vm2622_vm14, %vm2552_vm10  ;;  %v333_v58 = vmul.f32 %v1059_v46, %v1943_v30  ;;  %v1209_v54 = vpack.c.bf16 %v2040_v24, %v2029_v7  ;;  %vm509_vm9 = vcmp.eq.f32.partialorder %v1775_v41, 2.0  ;;  %vm2623_vm1 = vcmp.eq.f32.partialorder %v1793_v60, 2.0 }
  0x8b   : > { %v305_v57 = vmul.f32 %v1051_v6, %v2016_v31  ;;  %v335_v16 = vmul.f32 %v2027_v14, %v1051_v6  ;;  %vm1297_vm7 = vmpackc.low %vm2555_vm15, %vm2558_vm0  ;;  %vm2624_vm14 = vcmp.eq.f32.partialorder %v1771_v39, 2.0  ;;  %v347_v56 = vmul.f32 %v1053_v9, %v1812_v17 }
  0x8c   : > { %vm2093_vm10 = vmpackc.low %vm2624_vm14, %vm2623_vm1  ;;  %vm2627_vm8 = vcmp.eq.f32.partialorder %v1775_v41, 0.0  ;;  %vm2628_vm12 = vcmp.eq.f32.partialorder %v1866_v12, 0.0  ;;  %v1215_v55 = vpack.c.bf16 %v2067_v34, %v2065_v21  ;;  %v2110_v6 = vmul.f32 0.5, %v348_v43 }
  0x8d   : > { %v2072_v32 = vmul.f32 0.5, %v305_v57  ;;  %vm2104_vm15 = vmpackc.low %vm2628_vm12, %vm2627_vm8  ;;  %v349_v27 = vmul.f32 %v1055_v11, %v1814_v18  ;;  %v1212_v17 = vpack.c.bf16 %v2078_v29, %v2047_v15  ;;  %vm2631_vm1 = vcmp.eq.f32.partialorder %v1866_v12, 2.0 }
  0x8e   : > { %vm2119_vm8 = vmpackc.low %vm2631_vm1, %vm509_vm9  ;;  %v2123_v57 = vmul.f32 -1.0, %v333_v58  ;;  %v2125_v34 = vmul.f32 -1.0, %v335_v16  ;;  %v2127_v43 = vmul.f32 0.5, %v350_v48  ;;  %vm2634_vm12 = vcmp.eq.f32.partialorder %v1874_v49, 0.0 }
  0x8f   : > { %v1206_v1 = vpack.c.bf16 %v2044_v5, %v2072_v32  ;;  %v352_v58 = vmul.f32 %v1979_v62, %v1810_v8  ;;  %v354_v48 = vmul.f32 %v1060_v45, %v1881_v53  ;;  %vm2559_vm14 = vcmp.eq.f32.partialorder %v1765_v36, 1.0 }
  0x90   : > { %v2146_v11 = vmul.f32 0.5, %v347_v56  ;;  %vm2640_vm1 = vcmp.eq.f32.partialorder %v1874_v49, 2.0  ;;  %v2164_v53 = vmul.f32 0.5, %v349_v27  ;;  %v351_v62 = vmul.f32 %v2005_v50, %v1927_v19 }
  0x91   : > { %1208 = vmatpush1.bf16.msk.msra.mxu1 %vm1207_vm13, %v1206_v1  ;;  %1298 = vmatpush1.bf16.msk.msra.mxu0 %vm1297_vm7, %v1206_v1  ;;  %vm2635_vm13 = vcmp.eq.f32.partialorder %v1937_v3, 0.0  ;;  %v1218_v45 = vpack.c.bf16 %v2125_v34, %v2123_v57  ;;  %v353_v20 = vmul.f32 %v1059_v46, %v1930_v22  ;;  %v2643_v19 = vmov 0 }
  0x92   : > { %1211 = vmatprep.subr.msk.bf16.mxu1 %vm2035_vm5, %v1209_v54  ;;  %1301 = vmatprep.subr.msk.bf16.mxu0 %vm2061_vm3, %v1209_v54  ;;  %vm2137_vm7 = vmpackc.low %vm2635_vm13, %vm2634_vm12  ;;  %vm2557_vm5 = vcmp.eq.f32.partialorder %v1767_v37, 1.0  ;;  %vm2561_vm13 = vcmp.eq.f32.partialorder %v1773_v40, 1.0  ;;  %v356_v50 = vmul.f32 %v1995_v13, %v1879_v52  ;;  %v1221_v22 = vpack.c.bf16 %v2127_v43, %v2110_v6 }
  0x93   : > { %vm2152_vm3 = vmpackc.low %vm2557_vm5, %vm2559_vm14  ;;  %vm2560_vm5 = vcmp.eq.f32.partialorder %v1775_v41, 1.0  ;;  %v2195_v46 = vmul.f32 0.5, %v352_v58  ;;  %v2197_v16 = vmul.f32 0.5, %v354_v48  ;;  %v2649_v52 = vmov 0 }
  0x94   : > { %vm2160_vm12 = vmpackc.low %vm2558_vm0, %vm2640_vm1  ;;  %vm2567_vm1 = vcmp.eq.f32.partialorder %v1765_v36, 3.0  ;;  %vm2562_vm0 = vcmp.eq.f32.partialorder %v1767_v37, 3.0  ;;  %v2651_v13 = vmov 0  ;;  %v1224_v63 = vpack.c.bf16 %v2164_v53, %v2146_v11 }
  0x95   : > { %1214 = vmatpush1.bf16.msk.msra.mxu1 %vm2104_vm15, %v1212_v17  ;;  %1304 = vmatpush1.bf16.msk.msra.mxu0 %vm2119_vm8, %v1212_v17  ;;  %vm2183_vm14 = vmpackc.low %vm2560_vm5, %vm2561_vm13  ;;  %vm2648_vm8 = vcmp.eq.f32.partialorder %v1767_v37, 2.0  ;;  %vm2564_vm5 = vcmp.eq.f32.partialorder %v1773_v40, 3.0  ;;  %vm2563_vm13 = vcmp.eq.f32.partialorder %v1775_v41, 3.0  ;;  %v2231_v0 = vmul.f32 0.5, %v351_v62 }
  0x96   : > { %v2644_v19 = vsel %vm2183_vm14, 4294967295, %v2643_v19  ;;  %1217 = vmatprep.subr.msk.bf16.mxu1 %vm2053_vm2, %v1215_v55  ;;  %1307 = vmatprep.subr.msk.bf16.mxu0 %vm2093_vm10, %v1215_v55  ;;  %vm2203_vm15 = vmpackc.low %vm2562_vm0, %vm2567_vm1  ;;  %vm2647_vm2 = vcmp.eq.f32.partialorder %v1765_v36, 2.0  ;;  %v2233_v1 = vmul.f32 0.5, %v353_v20  ;;  %v355_v56 = vmul.f32 %v2027_v14, %v2016_v31 }
  0x97   : > { %vm2211_vm10 = vmpackc.low %vm2648_vm8, %vm2647_vm2  ;;  %v2237_v30 = vmul.f32 0.5, %v356_v50  ;;  %v1227_v55 = vpack.c.bf16 %v2197_v16, %v2195_v46  ;;  %v2654_v27 = vmov 0  ;;  %vm2568_vm8 = vcmp.eq.f32.partialorder %v1769_v38, 1.0 }
  0x98   : > { %v2650_v52 = vsel %vm2211_vm10, 4294967295, %v2649_v52  ;;  %vm2221_vm0 = vmpackc.low %vm2563_vm13, %vm2564_vm5  ;;  %v1230_v28 = vpack.c.bf16 %v2233_v1, %v2231_v0  ;;  %v2259_v31 = vmul.f32 0.5, %v355_v56  ;;  %vm2660_vm5 = vcmp.eq.f32.partialorder %v1937_v3, 0.0 }
  0x99   : > { %v2652_v13 = vsel %vm2221_vm0, 4294967295, %v2651_v13  ;;  %1220 = vmatpush1.bf16.msk.msra.mxu1 %vm2137_vm7, %v1218_v45  ;;  %1310 = vmatpush1.bf16.msk.msra.mxu0 %vm2160_vm12, %v1218_v45  ;;  %vm2653_vm7 = vcmp.eq.f32.partialorder %v1773_v40, 2.0  ;;  %v1233_v14 = vpack.c.bf16 %v1825_v25, %v2237_v30  ;;  %v1254_v9 = vpack.c.bf16 %v2047_v15, %v2044_v5  ;;  %v2715_v5 = vld [vmem:[#allocation13_spill] sm:$0xff]  ;;  %v647_v15 = vld [vmem:[#allocation6] sm:$0xff] }
  0x9a   : > { %1223 = vmatprep.subr.msk.bf16.mxu1 %vm1837_vm4, %v1221_v22  ;;  %1313 = vmatprep.subr.msk.bf16.mxu0 %vm2211_vm10, %v1221_v22  ;;  %vm2249_vm12 = vmpackc.low %vm509_vm9, %vm2653_vm7  ;;  %vm2656_vm4 = vnez %v2604_v51  ;;  %vm2657_vm9 = vcmp.eq.f32.partialorder %v1771_v39, 0.0  ;;  %vm2659_vm7 = vcmp.eq.f32.partialorder %v1771_v39, 2.0  ;;  %vm2664_vm10 = vnez %v2610_v59 }
  0x9b   : > { %v2655_v27 = vsel %vm2249_vm12, 4294967295, %v2654_v27  ;;  %vm1324_vm13 = vmpackc.low %vm2567_vm1, %vm2659_vm7  ;;  %v1236_v44 = vpack.c.bf16 %v1851_v35, %v2259_v31  ;;  %v1239_v51 = vpack.c.bf16 %v1897_v61, %v1827_v26  ;;  %vm2571_vm1 = vcmp.eq.f32.partialorder %v1793_v60, 1.0 }
  0x9c   : > { %v2678_v61 = vmov 0  ;;  %v1245_v59 = vpack.c.bf16 %v1948_v33, %v1906_v10  ;;  %v2686_v33 = vmov 0 }
  0x9d   : > { %1226 = vmatpush1.bf16.msk.msra.mxu1 %vm1862_vm6, %v1224_v63  ;;  %1316 = vmatpush1.bf16.msk.msra.mxu0 %vm2249_vm12, %v1224_v63  ;;  %vm2658_vm6 = vcmp.eq.f32.partialorder %v1765_v36, 1.0  ;;  %vm2661_vm12 = vcmp.eq.f32.partialorder %v1773_v40, 1.0 }
  0x9e   : > { %1229 = vmatprep.subr.msk.bf16.mxu1 %vm1912_vm11, %v1227_v55  ;;  %1319 = vmatprep.subr.msk.bf16.mxu0 %vm2656_vm4, %v1227_v55  ;;  %vm1234_vm2 = vmpackc.low %vm2658_vm6, %vm2657_vm9  ;;  %vm2665_vm9 = vnez %v2612_v4  ;;  %vm2666_vm6 = vcmp.eq.f32.partialorder %v1767_v37, 1.0  ;;  %vm2569_vm4 = vcmp.eq.f32.partialorder %v1771_v39, 1.0  ;;  %v2688_v4 = vld [vmem:[#allocation14_spill] sm:$0xff] }
  0x9f   : > { %vm2280_vm11 = vmpackc.low %vm2661_vm12, %vm2660_vm5  ;;  %vm2570_vm5 = vcmp.eq.f32.partialorder %v1866_v12, 1.0  ;;  %vm2670_vm12 = vcmp.eq.f32.partialorder %v1773_v40, 3.0  ;;  %v1251_v17 = vpack.c.bf16 %v2029_v7, %v2688_v4  ;;  %v1257_v7 = vpack.c.bf16 %v2065_v21, %v2040_v24 }
  0xa0   : > { %vm2295_vm7 = vmpackc.low %vm2568_vm8, %vm2666_vm6  ;;  %vm2671_vm6 = vcmp.eq.f32.partialorder %v1767_v37, 3.0  ;;  %vm2672_vm8 = vcmp.eq.f32.partialorder %v1769_v38, 3.0  ;;  %v1242_v37 = vpack.c.bf16 %v1963_v47, %v1853_v42  ;;  %v2683_v47 = vmov 0 }
  0xa1   : > { %1232 = vmatpush1.bf16.msk.msra.mxu1 %vm2664_vm10, %v1230_v28  ;;  %1322 = vmatpush1.bf16.msk.msra.mxu0 %vm2665_vm9, %v1230_v28  ;;  %vm2669_vm10 = vcmp.eq.f32.partialorder %v1937_v3, 2.0  ;;  %vm2312_vm0 = vmpackc.low %vm2672_vm8, %vm2671_vm6  ;;  %vm2577_vm6 = vcmp.eq.f32.partialorder %v1874_v49, 1.0  ;;  %v1260_v24 = vpack.c.bf16 %v2123_v57, %v2078_v29  ;;  %v1266_v29 = vpack.c.bf16 %v2146_v11, %v2125_v34 }
  0xa2   : > { %1235 = vmatprep.subr.msk.bf16.mxu1 %vm1234_vm2, %v1233_v14  ;;  %1325 = vmatprep.subr.msk.bf16.mxu0 %vm1324_vm13, %v1233_v14  ;;  %vm1327_vm9 = vmpackc.low %vm2670_vm12, %vm2669_vm10  ;;  %vm2576_vm2 = vcmp.eq.f32.partialorder %v1866_v12, 3.0  ;;  %vm2675_vm13 = vcmp.eq.f32.partialorder %v1775_v41, 1.0  ;;  %vm584_vm10 = vcmp.eq.f32.partialorder %v1793_v60, 3.0  ;;  %vm2572_vm12 = vcmp.eq.f32.partialorder %v1771_v39, 3.0 }
  0xa3   : > { %vm2321_vm14 = vmpackc.low %vm2570_vm5, %vm2675_vm13  ;;  %vm2574_vm13 = vcmp.eq.f32.partialorder %v1937_v3, 1.0  ;;  %vm2575_vm5 = vcmp.eq.f32.partialorder %v1874_v49, 3.0 }
  0xa4   : > { %vm2335_vm8 = vmpackc.low %vm2569_vm4, %vm2571_vm1  ;;  %vm2573_vm1 = vcmp.eq.f32.partialorder %v1937_v3, 3.0 }
  0xa5   : > { %1238 = vmatpush1.bf16.msk.msra.mxu1 %vm2280_vm11, %v1236_v44  ;;  %1328 = vmatpush1.bf16.msk.msra.mxu0 %vm1327_vm9, %v1236_v44  ;;  %v2679_v61 = vsel %vm2335_vm8, 4294967295, %v2678_v61  ;;  %vm2680_vm11 = vcmp.eq.f32.partialorder %v1775_v41, 3.0  ;;  %vm2359_vm4 = vmpackc.low %vm2572_vm12, %vm584_vm10  ;;  %v2685_v41 = vld [vmem:[#allocation15_spill] sm:$0xff] }
  0xa6   : > { %1241 = vmatprep.subr.msk.bf16.mxu1 %vm2295_vm7, %v1239_v51  ;;  %1331 = vmatprep.subr.msk.bf16.mxu0 %vm2312_vm0, %v1239_v51  ;;  %vm2349_vm9 = vmpackc.low %vm2576_vm2, %vm2680_vm11  ;;  %v2684_v47 = vsel %vm2359_vm4, 4294967295, %v2683_v47  ;;  %v1248_v10 = vpack.c.bf16 %v2072_v32, %v2685_v41  ;;  %v2689_v32 = vmov 0  ;;  %vm2693_vm2 = vcmp.eq.f32.partialorder %v1769_v38, 3.0 }
  0xa7   : > { %vm2375_vm11 = vmpackc.low %vm2574_vm13, %vm2577_vm6  ;;  %vm2692_vm13 = vcmp.eq.f32.partialorder %v1793_v60, 1.0 }
  0xa8   : > { %v2687_v33 = vsel %vm2375_vm11, 4294967295, %v2686_v33  ;;  %vm2389_vm12 = vmpackc.low %vm2573_vm1, %vm2575_vm5  ;;  %vm2691_vm1 = vcmp.eq.f32.partialorder %v1769_v38, 1.0  ;;  %v2700_v38 = vld [vmem:[#allocation16_spill] sm:$0xff] }
  0xa9   : > { %1244 = vmatpush1.bf16.msk.msra.mxu1 %vm2321_vm14, %v1242_v37  ;;  %1334 = vmatpush1.bf16.msk.msra.mxu0 %vm2349_vm9, %v1242_v37  ;;  %v2690_v32 = vsel %vm2389_vm12, 4294967295, %v2689_v32  ;;  %vm1258_vm5 = vmpackc.low %vm2692_vm13, %vm2691_vm1  ;;  %vm2698_vm1 = vcmp.eq.f32.partialorder %v1771_v39, 1.0  ;;  %vm2699_vm13 = vcmp.eq.f32.partialorder %v1765_v36, 1.0  ;;  %v1263_v60 = vpack.c.bf16 %v2110_v6, %v2700_v38 }
  0xaa   : > { %1247 = vmatprep.subr.msk.bf16.mxu1 %vm2335_vm8, %v1245_v59  ;;  %1337 = vmatprep.subr.msk.bf16.mxu0 %vm2359_vm4, %v1245_v59  ;;  %vm1348_vm6 = vmpackc.low %vm584_vm10, %vm2693_vm2  ;;  %vm2697_vm4 = vnez %v2652_v13  ;;  %vm2701_vm2 = vcmp.eq.f32.partialorder %v1866_v12, 3.0  ;;  %vm2702_vm10 = vcmp.eq.f32.partialorder %v1874_v49, 3.0 }
  0xab   : > { %vm1264_vm8 = vmpackc.low %vm2699_vm13, %vm2698_vm1  ;;  %vm2707_vm13 = vcmp.eq.f32.partialorder %v1937_v3, 3.0 }
  0xad   : > { %1250 = vmatpush1.bf16.msk.msra.mxu1 %vm2375_vm11, %v1248_v10  ;;  %1340 = vmatpush1.bf16.msk.msra.mxu0 %vm2389_vm12, %v1248_v10  ;;  %vm2694_vm12 = vcmp.eq.f32.partialorder %v1866_v12, 1.0  ;;  %v1269_v12 = vpack.c.bf16 %v2195_v46, %v2127_v43 }
  0xae   : > { %1253 = vmatprep.subr.msk.bf16.mxu1 %vm2152_vm3, %v1251_v17  ;;  %1343 = vmatprep.subr.msk.bf16.mxu0 %vm2203_vm15, %v1251_v17  ;;  %vm2695_vm3 = vcmp.eq.f32.partialorder %v1874_v49, 1.0  ;;  %vm2696_vm15 = vnez %v2644_v19  ;;  %v649_v49 = vld [vmem:[#allocation6 + $0x10] sm:$0xff] }
  0xaf   : > { %vm1261_vm11 = vmpackc.low %vm2695_vm3, %vm2694_vm12  ;;  %vm2704_vm3 = vcmp.eq.f32.partialorder %v1765_v36, 3.0  ;;  %v1272_v36 = vpack.c.bf16 %v2231_v0, %v2164_v53 }
  0xb0   : > { %vm1351_vm12 = vmpackc.low %vm2702_vm10, %vm2701_vm2  ;;  %vm2708_vm2 = vcmp.eq.f32.partialorder %v1773_v40, 3.0 }
  0xb1   : > { %1256 = vmatpush1.bf16.msk.msra.mxu1 %vm2696_vm15, %v1254_v9  ;;  %1346 = vmatpush1.bf16.msk.msra.mxu0 %vm2697_vm4, %v1254_v9  ;;  %vm2703_vm4 = vcmp.eq.f32.partialorder %v1771_v39, 3.0  ;;  %vm1357_vm10 = vmpackc.low %vm2708_vm2, %vm2707_vm13  ;;  %v1275_v39 = vpack.c.bf16 %v2237_v30, %v2197_v16 }
  0xb2   : > { %1259 = vmatprep.subr.msk.bf16.mxu1 %vm1258_vm5, %v1257_v7  ;;  %1349 = vmatprep.subr.msk.bf16.mxu0 %vm1348_vm6, %v1257_v7  ;;  %vm1354_vm15 = vmpackc.low %vm2704_vm3, %vm2703_vm4  ;;  %vm2705_vm5 = vcmp.eq.f32.partialorder %v1937_v3, 1.0  ;;  %vm2706_vm6 = vcmp.eq.f32.partialorder %v1773_v40, 1.0  ;;  %v1278_v40 = vpack.c.bf16 %v2259_v31, %v2233_v1  ;;  %v2713_v3 = vld [vmem:[#allocation12_spill] sm:$0xff] }
  0xb3   : > { %vm1267_vm1 = vmpackc.low %vm2706_vm6, %vm2705_vm5 }
  0xb5   : > { %1262 = vmatpush1.bf16.msk.msra.mxu1 %vm1261_vm11, %v1260_v24  ;;  %1352 = vmatpush1.bf16.msk.msra.mxu0 %vm1351_vm12, %v1260_v24  ;;  %vm2712_vm11 = vnez %v2690_v32 }
  0xb6   : > { %1265 = vmatprep.subr.msk.bf16.mxu1 %vm1264_vm8, %v1263_v60  ;;  %1355 = vmatprep.subr.msk.bf16.mxu0 %vm1354_vm15, %v1263_v60  ;;  %vm2709_vm8 = vnez %v2679_v61 }
  0xb9   : > { %1268 = vmatpush1.bf16.msk.msra.mxu1 %vm1267_vm1, %v1266_v29  ;;  %1358 = vmatpush1.bf16.msk.msra.mxu0 %vm1357_vm10, %v1266_v29 }
  0xba   : > { %1271 = vmatprep.subr.msk.bf16.mxu1 %vm2295_vm7, %v1269_v12  ;;  %1361 = vmatprep.subr.msk.bf16.mxu0 %vm2312_vm0, %v1269_v12  ;;  %vm2710_vm7 = vnez %v2684_v47  ;;  %vm2711_vm0 = vnez %v2687_v33 }
  0xbd   : > { %1274 = vmatpush1.bf16.msk.msra.mxu1 %vm2321_vm14, %v1272_v36  ;;  %1364 = vmatpush1.bf16.msk.msra.mxu0 %vm2349_vm9, %v1272_v36  ;;  %vm2714_vm14 = vnez %v2650_v52  ;;  %vm2716_vm9 = vnez %v2655_v27 }
  0xbe   : > { %1277 = vmatprep.subr.msk.bf16.mxu1 %vm2709_vm8, %v1275_v39  ;;  %1367 = vmatprep.subr.msk.bf16.mxu0 %vm2710_vm7, %v1275_v39 }
  0xc1   : > { %1280 = vmatpush1.bf16.msk.msra.mxu1 %vm2711_vm0, %v1278_v40  ;;  %1370 = vmatpush1.bf16.msk.msra.mxu0 %vm2712_vm11, %v1278_v40 }
  0xc2   : > { %1283 = vmatprep.subr.msk.bf16.mxu1 %vm2714_vm14, %v2713_v3 }
  0xc4   : > { %911 = vmatmul.mubr.f32.vlgmr.msra.gmra.mrb[0].mxu0 %v649_v49 }
  0xc5   : > { %1286 = vmatpush1.bf16.msk.msra.mxu1 %vm2716_vm9, %v2715_v5 }
  0xc8   : > { %840 = vmatmul.mubr.f32.vlgmr.msra.gmra.mrb[0].mxu1 %v647_v15 }
 0x197   : > { %v912_v21 = vpop.f32.mrb[0].mxu0 }
 0x198   : > { %v914_v34 = vpop.f32.mrb[1].mxu0 }
 0x19b   : > { %v841_v6 = vpop.f32.mrb[0].mxu1 }
 0x19c   : > { %v913_v57 = vadd.f32 %v912_v21, %v841_v6  ;;  %v843_v43 = vpop.f32.mrb[1].mxu1 }
 0x19d   : > { %v915_v18 = vadd.f32 %v914_v34, %v843_v43 }
 0x19e   : > { %917 = vst [vmem:[%s174_s28] sm:$0xff] %v913_v57 }
 0x19f   : > { %918 = vst [vmem:[%s174_s28 + $0x8] sm:$0xff] %v915_v18 }
 0x1a0   : > { %1506 = shalt.err (!%p1503_p13)
}
 0x1a1   : > { %s1507_s19 = scalar_lea.hbm %s2482_s8, 256  ;;  %s1511_s4 = scalar_lea.hbm %s2528_s2, 512 }
 0x1a2   : > { %p1508_p7 = scmp.ne.s32.totalorder %s2482_s8, %s1507_s19  ;;  %p1512_p1 = scmp.lt.u32.totalorder %s2482_s8, %s2528_s2 }
 0x1a3   : > { %p1513_p11 = scmp.lt.u32.totalorder %s1511_s4, %s1507_s19  ;;  %p1515_p9 = scmp.lt.u32.totalorder %s1507_s19, %s2482_s8 }
 0x1a4   : > { %p1509_p3 = pnand %p1508_p7, %p2717_p10 }
 0x1a5   : > { %p1514_p8 = por %p1513_p11, %p1512_p1 }
 0x1a6   : > { %p1510_p12 = pneg %p1509_p3 }
 0x1a7   : > { %p1516_p2 = por %p1515_p9, %p1514_p8 }
 0x1a9   : > { %p1517_p4 = pnand %p1516_p2, %p1510_p12 }
 0x1ab   : > { %1520 = shalt.err (!%p1517_p4)
}
 0x1ac   : > { %1381 = dma.vmem_to_hbm [thread:$0]  (%p2717_p10), %s2484_s30, 256, %s2482_s8, %s920_s14  }
 0x1ad PF: > { %s946_s29 = sand.u32 1, %s1551_s9   ;;  %p2718_p5 = scmp.ne.s32.totalorder %s2585_s22, 0 }
 0x1ae   : > { %p2719_p0 = scmp.ge.s32.totalorder %s1563_s12, 2  ;;  %s947_s7 = scalar_lea.sflag [#allocation5], %s946_s29 }
 0x1b0   : > { %p1392_p6 = pnand %p2719_p0, %p2718_p5 }
 0x1b2   : > { %1546 = dma.done.wait (!%p1392_p6), %s947_s7, 256  }
 0x1b3   : > { %1548 = vsyncadd (!%p1392_p6), %s947_s7, 4294967040  ;;  %p16_p13 = scmp.ge.s32.totalorder %s1611_s15, 4   ;;  %s2720_s9 = smov %s1555_s10 }
 0x1b4   : > { %s2721_s10 = smov %s1559_s11  ;;  %s2722_s11 = smov %s1623_s18 }
 0x1b5   : > { %s2723_s12 = smov %s1611_s15  ;;  %18 = sbr.rel (!%p16_p13) target bundleno = 6 (0x6), region = 77 }
 0x1bc   :  { %952 = vsyncpa [#allocation4], 1 }
 0x1bd   :  { %954 = vsyncpa [#allocation4 + $0x1], 1 }
 0x1be   :  { %955 = vsyncpa [#allocation7], 1 }
 0x1bf   :  { %956 = vsyncpa [#allocation5], 1 }
 0x1c0   :  { %958 = vsyncpa [#allocation5 + $0x1], 1 }

</bundles_post_ra>
